<compile_context>
chip_gen: v7x
topology: tpu7x:2x2x1
jax: 0.10.0
libtpu: 0.0.40
codegen_flags: <defaults>
</compile_context>

<pallas_src>
import functools

import jax
import jax.numpy as jnp
from jax.experimental import pallas as pl
from jax.experimental.pallas import tpu as pltpu


def _coord_kernel(r_ref, mc_ref, o_ref):
    # Entire forward for this row tile is one native-bf16 MXU matmul with f32
    # accumulation:
    #   out[i, 2j]   = i*sx + motion_x[rs[i], cs[j]]*sx + mn
    #   out[i, 2j+1] = j*sy + motion_y[rs[i], cs[j]]*sy + mn
    # No iota, no selects, no casts: MXU pop + lane-dense store only.
    o_ref[...] = jnp.dot(r_ref[...], mc_ref[...],
                         preferred_element_type=jnp.float32)


def _bf16x3_split(x):
    """Split f32 -> three bf16 chunks whose f32 sum reconstructs x (~1 ulp)."""
    hi = x.astype(jnp.bfloat16)
    r1 = x - hi.astype(jnp.float32)
    mid = r1.astype(jnp.bfloat16)
    lo = (r1 - mid.astype(jnp.float32)).astype(jnp.bfloat16)
    return hi, mid, lo


def _pick_row_tile(h, two_w, target_bytes=1 << 20):
    """~1 MiB f32 output blocks (already >=85% of the measured HBM roofline),
    sized for v7x's 64 MiB VMEM, and capped so the grid has >=2 (>=4 for
    larger h) row tiles so v7x megacore sharding actually engages."""
    bytes_per_row = max(two_w * 4, 1)
    rows = max(8, (target_bytes // bytes_per_row) // 8 * 8)
    if h >= 64:
        rows = min(rows, max(8, (h // 4) // 8 * 8))
    elif h >= 16:
        rows = min(rows, max(8, (h // 2) // 8 * 8))
    rows = min(rows, h)
    if rows < h:
        rows = max(8, (rows // 8) * 8)   # (8,128) rule: sub-full tiles need %8 rows
    return int(rows)


@functools.partial(jax.jit, static_argnames=("shape", "normalize_range", "row_tile"))
def shapemotion2coordinate(motion, shape, normalize_range=(0.0, 1.0), row_tile=None):
    h, w = int(shape[0]), int(shape[1])
    _, _, hm, wm = motion.shape
    mn, mx = float(normalize_range[0]), float(normalize_range[1])
    two_w = 2 * w
    rng = mx - mn
    # NB: h == 1 or w == 1 divides by zero exactly as the PyTorch reference does.
    sx = rng / (h - 1)
    sy = rng / (w - 1)

    # Static nearest-neighbour source indices (PyTorch default 'nearest':
    # src = floor(dst * in_size / out_size)).
    row_src = (jnp.arange(h) * hm) // h                                  # (h,)
    col_src = (jnp.arange(w) * wm) // w                                  # (w,)

    # ---------------- MC: (3*Hm + 6, 2w) bf16 constant ----------------------
    m = motion[0].astype(jnp.float32)                                    # (2, Hm, Wm)
    # Column-gathered, x/y lane-interleaved motion, pre-scaled per lane parity.
    mc = jnp.stack([m[0][:, col_src] * sx,
                    m[1][:, col_src] * sy], axis=-1).reshape(hm, two_w)
    # Lane-constant bias: mn on x lanes, j*sy + mn on y lanes.
    jj = jnp.arange(w, dtype=jnp.float32)
    bias = jnp.stack([jnp.full((w,), mn, jnp.float32),
                      jj * sy + mn], axis=-1).reshape(1, two_w)
    # x-lane indicator (exact in bf16): distributes the per-row i*sx term.
    ind = jnp.stack([jnp.ones((w,), jnp.float32),
                     jnp.zeros((w,), jnp.float32)], axis=-1).reshape(1, two_w)
    ind_bf = ind.astype(jnp.bfloat16)
    mc3 = jnp.concatenate(
        list(_bf16x3_split(mc)) + list(_bf16x3_split(bias)) + [ind_bf] * 3,
        axis=0)                                                          # (3*Hm+6, 2w)
    K = 3 * hm + 6

    # ---------------- R: (h_pad, 3*Hm + 6) bf16 constant --------------------
    r1 = jax.nn.one_hot(row_src, hm, dtype=jnp.bfloat16)                 # (h, Hm), 0/1 exact
    ones = jnp.ones((h, 1), jnp.bfloat16)
    rvals = jnp.arange(h, dtype=jnp.float32) * sx                        # per-row i*sx
    rv_hi, rv_mid, rv_lo = _bf16x3_split(rvals)
    r3 = jnp.concatenate(
        [r1, r1, r1, ones, ones, ones,
         rv_hi[:, None], rv_mid[:, None], rv_lo[:, None]], axis=1)       # (h, K)

    th = row_tile if row_tile is not None else _pick_row_tile(h, two_w)
    th = min(int(th), h)
    if th < h:
        th = max(8, (th // 8) * 8)
    grid = (pl.cdiv(h, th),)
    h_pad = grid[0] * th
    if h_pad != h:
        # Pad R so every *input* block is fully in-bounds; only the ragged tail
        # of the output block relies on Pallas' standard OOB-write masking.
        r3 = jnp.pad(r3, ((0, h_pad - h), (0, 0)))

    # VMEM budget from the actual block sizes (double-buffered in/out blocks,
    # grid-invariant MC, plus generous headroom); fits v7x's 64 MiB VMEM.
    blk_out = th * two_w * 4
    blk_r = th * K * 2
    blk_mc = K * two_w * 2
    vmem_limit = int(min(32 << 20, max(16 << 20,
                                       4 * (blk_out + blk_r) + 2 * blk_mc + (4 << 20))))

    out2d = pl.pallas_call(
        _coord_kernel,
        out_shape=jax.ShapeDtypeStruct((h, two_w), jnp.float32),
        grid_spec=pltpu.PrefetchScalarGridSpec(
            num_scalar_prefetch=0,
            grid=grid,
            in_specs=[
                pl.BlockSpec((th, K), lambda i: (i, 0)),       # R row tile
                pl.BlockSpec((K, two_w), lambda i: (0, 0)),    # MC, grid-invariant
            ],
            out_specs=pl.BlockSpec((th, two_w), lambda i: (i, 0)),
        ),
        compiler_params=pltpu.CompilerParams(
            dimension_semantics=("parallel",),                 # v7x megacore sharding
            vmem_limit_bytes=vmem_limit,
        ),
        cost_estimate=pl.CostEstimate(
            flops=2 * h_pad * K * two_w,
            transcendentals=0,
            bytes_accessed=h * two_w * 4 + r3.size * 2 + mc3.size * 2),
    )(r3, mc3)

    # (h, 2w) -> (h, w, 2) is a pure row-major reshape: no data movement.
    return out2d.reshape(h, w, 2)


def _reference(motion, shape, normalize_range=(0.0, 1.0)):
    """Pure-JAX reference matching the PyTorch forward (nearest interpolate)."""
    h, w = shape
    hm, wm = motion.shape[2], motion.shape[3]
    row_src = (jnp.arange(h) * hm) // h
    col_src = (jnp.arange(w) * wm) // w
    re = motion[0][:, row_src, :][:, :, col_src]          # (2, h, w)
    x = jnp.arange(h, dtype=jnp.float32)[:, None] + re[0]
    y = jnp.arange(w, dtype=jnp.float32)[None, :] + re[1]
    mn, mx = normalize_range
    x = x / (h - 1) * (mx - mn) + mn
    y = y / (w - 1) * (mx - mn) + mn
    return jnp.stack([x, y], axis=-1)


if __name__ == "__main__":
    key = jax.random.PRNGKey(0)
    H, W = 16, 16                                         # target spatial 'shape'
    motion = jax.random.normal(key, (1, 2, 8, 8), dtype=jnp.float32)

    cord = shapemotion2coordinate(motion, shape=(H, W))
    jax.block_until_ready(cord)
    assert cord.shape == (H, W, 2) and cord.dtype == jnp.float32
    ref = _reference(motion, (H, W))
    assert float(jnp.max(jnp.abs(cord - ref))) < 1e-5

    # Non-square output + multi-tile grid with a ragged tail row-block.
    cord2 = shapemotion2coordinate(motion, shape=(44, 24), row_tile=8)
    jax.block_until_ready(cord2)
    ref2 = _reference(motion, (44, 24))
    assert cord2.shape == (44, 24, 2)
    assert float(jnp.max(jnp.abs(cord2 - ref2))) < 1e-5

    print("KERNEL_OK")
</pallas_src>

<mosaic_0001>
module attributes {stable_mosaic.version = 11 : i64} {
  func.func @_coord_kernel(%arg0: i32, %arg1: memref<8x30xbf16, #tpu.memory_space<vmem>>, %arg2: memref<30x32xbf16, #tpu.memory_space<vmem>>, %arg3: memref<8x32xf32, #tpu.memory_space<vmem>>) attributes {dimension_semantics = [#tpu.dimension_semantics<parallel>], iteration_bounds = array<i64: 2>, scalar_prefetch = 0 : i64, scratch_operands = 0 : i64, tpu.core_type = #tpu.core_type<tc>, window_params = [{transform_indices = @transform_0, window_bounds = array<i64: 8, 30>}, {pipeline_mode = #tpu.pipeline_mode<synchronous>, transform_indices = @transform_1, window_bounds = array<i64: 30, 32>}, {transform_indices = @transform_2, window_bounds = array<i64: 8, 32>}]} {
    %c0 = arith.constant 0 : index
    %c0_0 = arith.constant 0 : index
    %0 = vector.load %arg1[%c0, %c0_0] : memref<8x30xbf16, #tpu.memory_space<vmem>>, vector<8x30xbf16>
    %c0_1 = arith.constant 0 : index
    %c0_2 = arith.constant 0 : index
    %1 = vector.load %arg2[%c0_1, %c0_2] : memref<30x32xbf16, #tpu.memory_space<vmem>>, vector<30x32xbf16>
    %cst = arith.constant dense<0.000000e+00> : vector<8x32xf32>
    %2 = tpu.matmul %0, %1, %cst {dimension_numbers = #tpu.dot_dimension_numbers<[1], [0], [0], [1], [0, 0, 1, 1], [], []>} : vector<8x30xbf16>, vector<30x32xbf16>, vector<8x32xf32> -> vector<8x32xf32>
    %c0_3 = arith.constant 0 : index
    %c0_4 = arith.constant 0 : index
    %3 = vector.load %arg3[%c0_3, %c0_4] : memref<8x32xf32, #tpu.memory_space<vmem>>, vector<8x32xf32>
    tpu.vector_store %arg3[%c0_3, %c0_4], %2 {strides = array<i32>} : memref<8x32xf32, #tpu.memory_space<vmem>>, vector<8x32xf32>,
    return
  }
  func.func @transform_0(%arg0: i32) -> (i32, i32) {
    %c0_i32 = arith.constant 0 : i32
    %c0_i32_0 = arith.constant 0 : i32
    return %arg0, %c0_i32 : i32, i32
  }
  func.func @transform_1(%arg0: i32) -> (i32, i32) {
    %c0_i32 = arith.constant 0 : i32
    %c0_i32_0 = arith.constant 0 : i32
    %c0_i32_1 = arith.constant 0 : i32
    return %c0_i32, %c0_i32_0 : i32, i32
  }
  func.func @transform_2(%arg0: i32) -> (i32, i32) {
    %c0_i32 = arith.constant 0 : i32
    %c0_i32_0 = arith.constant 0 : i32
    return %arg0, %c0_i32 : i32, i32
  }
}

</mosaic_0001>

<bundles_post_ra>
// kernel: shapemotion2coordinate.1
= control target key start
LH: loop header
LB: loop body
LE: loop exit
PB: predicated region body
PF: predicated region fallthrough
CT: control target
= control target key end

     0   :  { %s319_s9 = smov 0   ;;  %s342_s0 = inlined_call_operand.vmem [shape: bf16[16,30], index: 0, kind: input, shape index: {}]   ;;  %s343_s1 = inlined_call_operand.vmem [shape: bf16[30,32], index: 1, kind: input, shape index: {}]   ;;  %s344_s2 = inlined_call_operand.vmem [shape: f32[16,32], index: 2, kind: output, shape index: {}]  }
   0x1 LB: > { %s259_s10 = sadd.s32 4294967295, %s300_s9   ;;  %p263_p0 = scmp.ge.s32.totalorder %s300_s9, 1  ;;  %s300_s9 = sphi %s319_s9, %s12_s9  }
   0x2   : > { %p111_p1 = scmp.lt.s32.totalorder %s300_s9, 3 }
   0x4   : > { %p112_p2 = pnand %p263_p0, %p111_p1 }
   0x5   : > { %v292_v0 = vld [vmem:[%s343_s1] sm:$0xff] (!%p112_p2)   ;;  %v302_v1 = vmov (!%p112_p2), 0.0   ;;  %v293_v2 = vld [vmem:[%s343_s1 + $0x8] sm:$0x7f] (!%p112_p2)   ;;  %vm160_vm0 = vcmask (!%p112_p2), 1046528   ;;  %p131_p3 = scmp.lt.s32.totalorder (!%p112_p2), %s259_s10, 1 }
   0x6   : > { %115 = sbr.rel (%p112_p2) target bundleno = 232 (0xe8), region = 28  ;;  %274 = vmatprep.subr.bf16.mxu0 (!%p112_p2), %v302_v1  ;;  %v162_v3 = vsel (!%p112_p2), %vm160_vm0, %v293_v2, 0  ;;  %vm303_vm1 = vmmov (!%p112_p2), 0   ;;  %vm156_vm2 = vcmask (!%p112_p2), 244736   ;;  %vm204_vm3 = vcmask (!%p112_p2), 261120  }
   0x7   : > { %275 = vmatpush3.bf16.msra.mxu0 (!%p112_p2), %v292_v0  ;;  %278 = vmatprep.mubr.msk.bf16.mxu0 (!%p112_p2), %vm303_vm1, %v302_v1 }
   0x8   : > { %276 = vmatprep.subr.bf16.mxu0 (!%p112_p2), %v302_v1 }
   0xb   : > { %277 = vmatpush3.bf16.msra.mxu0 (!%p112_p2), %v162_v3 }
   0xd   : > { %s346_s10 = smov (!%p131_p3, %s259_s10), 1 }
   0xe   : > { %s264_s15 = sshll.u32 %s346_s10, 2  ;;  %s265_s19 = sshll.u32 %s346_s10, 3 }
   0xf   : > { %s134_s18 = scalar_lea.vmem %s342_s0, %s264_s15  ;;  %s138_s22 = scalar_lea.vmem %s344_s2, %s265_s19 }
  0x10   : > { %v140_v4 = vld [vmem:[%s134_s18] sm:$0xf] }
  0x11   : > { %279 = vmatmul.mubr.msk.bf16.vlgmr.msra.gmra.mrb[0].mxu0 %vm156_vm2, %v140_v4 }
  0xe4   : > { %v198_v5 = vpop.f32.mrb[0].mxu0 }
  0xe5   : > { %205 = vst.msk [vmem:[%s138_s22] sm:$0xff] %vm204_vm3, %v198_v5  ;;  %v280_v6 = vpop.f32.mrb[1].mxu0 }
  0xe6   : > { %v201_v7 = vpop.f32.mrb[2].mxu0 }
  0xe7   : > { %v281_v8 = vpop.f32.mrb[3].mxu0 }
  0xe8 PF: > { %s12_s9 = sadd.s32 1, %s300_s9  }
  0xe9   : > { %p9_p4 = scmp.ge.s32.totalorder %s12_s9, 4  }
  0xeb   :  { %11 = sbr.rel (!%p9_p4) target bundleno = 1 (0x1), region = 58 }

</bundles_post_ra>
